<compile_context>
chip_gen: v7x
topology: tpu7x:2x2x1
jax: 0.10.0
libtpu: 0.0.40
codegen_flags: <defaults>
</compile_context>

<pallas_src>
import functools
import math

import jax
import jax.numpy as jnp
from jax.experimental import pallas as pl
from jax.experimental.pallas import tpu as pltpu

BN_EPS = 1e-5


def _round_up(v, m):
    return ((v + m - 1) // m) * m


def _softplus(x):
    # Numerically stable softplus using only exp/log (guaranteed lowering).
    return jnp.maximum(x, 0.0) + jnp.log(1.0 + jnp.exp(-jnp.abs(x)))


def _batchnorm(y, g_ref, be_ref, inv_n):
    """Training-mode BatchNorm1d (biased variance, eps=1e-5) folded into one
    per-feature scale/shift FMA.  Shifted one-pass statistics (subtract the
    first row per column) to avoid catastrophic cancellation when |mean|>>std.
    """
    ref_row = y[0:1, :]
    d = y - ref_row
    mu_d = jnp.sum(d, axis=0, keepdims=True) * inv_n
    var = jnp.maximum(jnp.sum(d * d, axis=0, keepdims=True) * inv_n - mu_d * mu_d, 0.0)
    mu = ref_row + mu_d
    scale = g_ref[...] * jax.lax.rsqrt(var + BN_EPS)
    shift = be_ref[...] - mu * scale
    return y * scale + shift


def _z2l_encoder_kernel(n_blocks, head_w, x_ref, *refs):
    """Fused forward.  Grid axis 0 tiles the gene (K) axis of the first layer.

    refs = [W0, g0, b0, W1, g1, b1, ..., W_head, g_head, b_head,
            out_ref, acc_ref]
      W*      bf16 [in_pad, out_pad]   (W0 arrives K-tiled: [tk, H0_pad])
      g*/b*   f32  [1, out_pad]        (BatchNorm gamma / beta)
      out_ref f32  [N, 2*head_w]       (loc | softplus(scale), lane-dense)
      acc_ref f32  [N, H0_pad]         (first-layer accumulator, VMEM scratch)
    """
    out_ref, acc_ref = refs[-2], refs[-1]
    p = refs[:-2]

    k = pl.program_id(0)
    n_rows = x_ref.shape[0]
    inv_n = 1.0 / n_rows

    @pl.when(k == 0)
    def _():
        acc_ref[...] = jnp.zeros_like(acc_ref)

    # First layer, K-tiled: log(1+x) on this gene tile, bf16 MXU matmul,
    # f32 accumulation across gene tiles.
    w0_ref = p[0]
    xt = jnp.log(1.0 + x_ref[...].astype(jnp.float32))
    acc_ref[...] += jnp.dot(xt.astype(w0_ref.dtype), w0_ref[...],
                            preferred_element_type=jnp.float32)

    @pl.when(k == pl.num_programs(0) - 1)
    def _():
        h = _batchnorm(acc_ref[...], p[1], p[2], inv_n)
        if n_blocks > 1:
            h = jnp.maximum(h, 0.0)                       # ReLU after block 0
            for l in range(1, n_blocks - 1):              # middle hidden blocks
                w_ref, g_ref, be_ref = p[3 * l:3 * l + 3]
                y = jnp.dot(h.astype(w_ref.dtype), w_ref[...],
                            preferred_element_type=jnp.float32)
                h = jnp.maximum(_batchnorm(y, g_ref, be_ref, inv_n), 0.0)
            # Fused head block (loc | scale), no ReLU (make_fc drops it).
            w_ref, g_ref, be_ref = p[-3], p[-2], p[-1]
            y = jnp.dot(h.astype(w_ref.dtype), w_ref[...],
                        preferred_element_type=jnp.float32)
            h = _batchnorm(y, g_ref, be_ref, inv_n)
        out_ref[:, :head_w] = h[:, :head_w].astype(out_ref.dtype)
        out_ref[:, head_w:] = _softplus(h[:, head_w:]).astype(out_ref.dtype)


def prepare_z2l_params(params, *, matmul_dtype=jnp.bfloat16, max_gene_tile=512):
    """One-time parameter prep (hoisted out of the forward path).

    params: list of (W [in,out] f32, gamma [1,out] f32, beta [1,out] f32), one
            tuple per Linear+BN block; last block has out = 2*z2_dim + 2.
            (Linear bias omitted: exactly cancelled by training-mode BN.)
    Pads all widths to 128-lane multiples (gamma=1 / beta=0 in the pad, so the
    pad columns stay exactly zero through BN/ReLU), fuses the two output heads
    into one weight, and casts matmul weights to bf16 once.
    """
    num_genes = params[0][0].shape[0]
    out_dim = params[-1][0].shape[1]
    assert out_dim % 2 == 0
    half = out_dim // 2                       # = z2_dim + 1
    head_w = _round_up(half, 128)

    hidden = [W.shape[1] for W, _, _ in params[:-1]]
    hidden_pad = [_round_up(h, 128) for h in hidden]

    k_pad = _round_up(num_genes, 128)
    tk = 128
    for cand in (1024, 512, 256, 128):
        if cand <= max(max_gene_tile, 128) and k_pad % cand == 0:
            tk = cand
            break

    in_pads = [k_pad] + hidden_pad            # padded fan-in per Linear block

    def pad_w(W, in_p, out_p):
        return jnp.pad(W, ((0, in_p - W.shape[0]),
                           (0, out_p - W.shape[1]))).astype(matmul_dtype)

    def pad_vec(v, out_p, fill):
        return jnp.pad(v, ((0, 0), (0, out_p - v.shape[1])),
                       constant_values=fill).astype(jnp.float32)

    flat = []
    for i, (W, g, be) in enumerate(params[:-1]):
        flat.extend([pad_w(W, in_pads[i], hidden_pad[i]),
                     pad_vec(g, hidden_pad[i], 1.0),
                     pad_vec(be, hidden_pad[i], 0.0)])

    # Fused head: [loc | scale], each half padded to head_w columns.
    W, g, be = params[-1]
    in_p = in_pads[-1]
    Wh = jnp.concatenate([pad_w(W[:, :half], in_p, head_w),
                          pad_w(W[:, half:], in_p, head_w)], axis=1)
    gh = jnp.concatenate([pad_vec(g[:, :half], head_w, 1.0),
                          pad_vec(g[:, half:], head_w, 1.0)], axis=1)
    bh = jnp.concatenate([pad_vec(be[:, :half], head_w, 0.0),
                          pad_vec(be[:, half:], head_w, 0.0)], axis=1)
    flat.extend([Wh, gh, bh])

    return {
        "flat": flat,
        "n_blocks": len(params),
        "num_genes": num_genes,
        "k_pad": k_pad,
        "tk": tk,
        "half": half,
        "head_w": head_w,
        "dims_padded": [k_pad] + hidden_pad + [2 * head_w],
    }


def _vmem_budget_bytes():
    cap = 128 * 1024 * 1024
    try:
        info = pltpu.get_tpu_info()
        cap = int(getattr(info, "vmem_capacity_bytes", cap))
    except Exception:
        pass
    # Leave ~1/4 headroom for compiler-internal scratch:
    # ~48 MiB on v7x (64 MiB physical/TC), ~96 MiB on v5e/v6e (128 MiB).
    return (cap * 3) // 4


def z2l_encoder_forward(x, prepared):
    """Pallas forward of Z2LEncoder.

    x: [N, num_genes] non-negative counts (any float dtype; log(1+x) inside).
    prepared: output of prepare_z2l_params().
    Returns (z2_loc, z2_scale, l_loc, l_scale), matching the PyTorch module.
    """
    n, num_genes = x.shape
    assert num_genes == prepared["num_genes"]
    flat = prepared["flat"]
    n_blocks = prepared["n_blocks"]
    k_pad, tk = prepared["k_pad"], prepared["tk"]
    half, head_w = prepared["half"], prepared["head_w"]
    dims_p = prepared["dims_padded"]
    h0_pad = dims_p[1]

    if k_pad != num_genes:
        # Zero-pad genes so every K tile is full; the padded W0 rows are zero
        # so the extra columns contribute exactly nothing.
        x = jnp.pad(x, ((0, 0), (0, k_pad - num_genes)))

    grid = (k_pad // tk,)

    x_spec = pl.BlockSpec((n, tk), lambda k: (0, k))
    w0_spec = pl.BlockSpec((tk, h0_pad), lambda k: (k, 0))
    rest_specs = [pl.BlockSpec(a.shape, lambda k: (0, 0)) for a in flat[1:]]
    out_spec = pl.BlockSpec((n, 2 * head_w), lambda k: (0, 0))

    # Rough cost / VMEM bookkeeping so XLA schedules around this call and the
    # generation-dependent scoped-VMEM default never bites.
    param_bytes = int(sum(a.size * a.dtype.itemsize for a in flat))
    x_bytes = int(n * k_pad * x.dtype.itemsize)
    out_bytes = int(n * 2 * head_w * 4)
    mm_flops = 2 * n * sum(a * b for a, b in zip(dims_p[:-1], dims_p[1:]))
    elem_flops = 10 * n * sum(dims_p[1:])
    transcendentals = n * k_pad + n * head_w
    resident = (2 * n * tk * x.dtype.itemsize          # x tile (double-buffered)
                + 2 * tk * h0_pad * 2                  # W0 tile (double-buffered)
                + param_bytes + out_bytes
                + 4 * n * (h0_pad + 4 * max(dims_p[1:])))
    vmem_limit = int(min(_vmem_budget_bytes(), max(8 << 20, 2 * resident)))

    kernel = functools.partial(_z2l_encoder_kernel, n_blocks, head_w)
    out = pl.pallas_call(
        kernel,
        out_shape=jax.ShapeDtypeStruct((n, 2 * head_w), jnp.float32),
        grid_spec=pltpu.PrefetchScalarGridSpec(
            num_scalar_prefetch=0,
            grid=grid,
            in_specs=[x_spec, w0_spec] + rest_specs,
            out_specs=out_spec,
            scratch_shapes=[pltpu.VMEM((n, h0_pad), jnp.float32)]),
        # The single grid axis is the first-layer K reduction -> "arbitrary".
        compiler_params=pltpu.CompilerParams(
            dimension_semantics=("arbitrary",),
            vmem_limit_bytes=vmem_limit),
        cost_estimate=pl.CostEstimate(
            flops=int(mm_flops + elem_flops),
            transcendentals=int(transcendentals),
            bytes_accessed=int(param_bytes + x_bytes + out_bytes)),
    )(x, *flat)

    loc, sc = out[:, :head_w], out[:, head_w:]
    z2_loc, l_loc = loc[:, :half - 1], loc[:, half - 1:half]
    z2_scale, l_scale = sc[:, :half - 1], sc[:, half - 1:half]
    return z2_loc, z2_scale, l_loc, l_scale


def init_z2l_params(key, num_genes, z2_dim, hidden_dims):
    """Deterministic synthetic parameters matching the nn.Module shapes.
    (No Linear bias: exactly cancelled by the following training-mode BN.)"""
    dims = [num_genes] + list(hidden_dims) + [2 * z2_dim + 2]
    params = []
    for in_dim, out_dim in zip(dims, dims[1:]):
        key, kw = jax.random.split(key)
        bound = 1.0 / math.sqrt(in_dim)
        W = jax.random.uniform(kw, (in_dim, out_dim), jnp.float32, -bound, bound)
        gamma = jnp.ones((1, out_dim), jnp.float32)   # BN weight init
        beta = jnp.zeros((1, out_dim), jnp.float32)   # BN bias init
        params.append((W, gamma, beta))
    return params


def _reference_forward(x, params, matmul_dtype=jnp.bfloat16):
    """Pure-JAX mirror (bf16 matmul operands, f32 BN with batch stats)."""
    def block(h, W, g, be):
        y = jnp.dot(h.astype(matmul_dtype), W.astype(matmul_dtype),
                    preferred_element_type=jnp.float32)
        mu = jnp.mean(y, axis=0, keepdims=True)
        var = jnp.mean((y - mu) ** 2, axis=0, keepdims=True)
        return (y - mu) * (g * jax.lax.rsqrt(var + BN_EPS)) + be

    h = jnp.log(1.0 + x)
    for W, g, be in params[:-1]:
        h = jnp.maximum(block(h, W, g, be), 0.0)
    W, g, be = params[-1]
    y = block(h, W, g, be)
    half = y.shape[-1] // 2
    h1, h2 = y[:, :half], y[:, half:]
    sp = jnp.maximum(h2, 0.0) + jnp.log(1.0 + jnp.exp(-jnp.abs(h2)))
    return h1[:, :-1], sp[:, :-1], h1[:, -1:], sp[:, -1:]


if __name__ == "__main__":
    key = jax.random.PRNGKey(0)
    k_x, k_p = jax.random.split(key)

    batch = 8
    num_genes = 384          # 3 gene tiles of 128 -> exercises the K grid
    z2_dim = 16
    hidden_dims = [64, 64]   # exercises 128-lane padding of hidden widths

    # Count-like non-negative inputs (the module applies log(1 + x)).
    x = jax.random.uniform(k_x, (batch, num_genes), jnp.float32, 0.0, 100.0)
    params = init_z2l_params(k_p, num_genes, z2_dim, hidden_dims)

    prepared = prepare_z2l_params(params)   # one-time (hoisted) weight prep
    outs = z2l_encoder_forward(x, prepared)
    outs = jax.block_until_ready(outs)
    z2_loc, z2_scale, l_loc, l_scale = outs

    assert z2_loc.shape == (batch, z2_dim)
    assert z2_scale.shape == (batch, z2_dim)
    assert l_loc.shape == (batch, 1)
    assert l_scale.shape == (batch, 1)

    # Tolerance accounts for bf16 matmul operands + differing K-tile
    # accumulation order vs the XLA reference (per the performance review).
    ref = _reference_forward(x, params)
    for got, want in zip(outs, ref):
        assert jnp.allclose(got, want, atol=5e-3, rtol=5e-3), "kernel/reference mismatch"
    assert bool(jnp.all(z2_scale > 0)) and bool(jnp.all(l_scale > 0))

    print("KERNEL_OK")
</pallas_src>

<mosaic_0001>
module attributes {stable_mosaic.version = 11 : i64} {
  func.func @_z2l_encoder_kernel(%arg0: i32, %arg1: memref<8x128xf32, #tpu.memory_space<vmem>>, %arg2: memref<128x128xbf16, #tpu.memory_space<vmem>>, %arg3: memref<1x128xf32, #tpu.memory_space<vmem>>, %arg4: memref<1x128xf32, #tpu.memory_space<vmem>>, %arg5: memref<128x128xbf16, #tpu.memory_space<vmem>>, %arg6: memref<1x128xf32, #tpu.memory_space<vmem>>, %arg7: memref<1x128xf32, #tpu.memory_space<vmem>>, %arg8: memref<128x256xbf16, #tpu.memory_space<vmem>>, %arg9: memref<1x256xf32, #tpu.memory_space<vmem>>, %arg10: memref<1x256xf32, #tpu.memory_space<vmem>>, %arg11: memref<8x256xf32, #tpu.memory_space<vmem>>, %arg12: memref<8x128xf32, #tpu.memory_space<vmem>>) attributes {dimension_semantics = [#tpu.dimension_semantics<arbitrary>], iteration_bounds = array<i64: 3>, scalar_prefetch = 0 : i64, scratch_operands = 1 : i64, tpu.core_type = #tpu.core_type<tc>, window_params = [{transform_indices = @transform_0, window_bounds = array<i64: 8, 128>}, {transform_indices = @transform_1, window_bounds = array<i64: 128, 128>}, {pipeline_mode = #tpu.pipeline_mode<synchronous>, transform_indices = @transform_2, window_bounds = array<i64: 1, 128>}, {pipeline_mode = #tpu.pipeline_mode<synchronous>, transform_indices = @transform_3, window_bounds = array<i64: 1, 128>}, {pipeline_mode = #tpu.pipeline_mode<synchronous>, transform_indices = @transform_4, window_bounds = array<i64: 128, 128>}, {pipeline_mode = #tpu.pipeline_mode<synchronous>, transform_indices = @transform_5, window_bounds = array<i64: 1, 128>}, {pipeline_mode = #tpu.pipeline_mode<synchronous>, transform_indices = @transform_6, window_bounds = array<i64: 1, 128>}, {pipeline_mode = #tpu.pipeline_mode<synchronous>, transform_indices = @transform_7, window_bounds = array<i64: 128, 256>}, {pipeline_mode = #tpu.pipeline_mode<synchronous>, transform_indices = @transform_8, window_bounds = array<i64: 1, 256>}, {pipeline_mode = #tpu.pipeline_mode<synchronous>, transform_indices = @transform_9, window_bounds = array<i64: 1, 256>}, {pipeline_mode = #tpu.pipeline_mode<synchronous>, transform_indices = @transform_10, window_bounds = array<i64: 8, 256>}]} {
    %c0_i32 = arith.constant 0 : i32
    %0 = arith.cmpi eq, %arg0, %c0_i32 : i32
    %1 = arith.extui %0 : i1 to i32
    %c0_i32_0 = arith.constant 0 : i32
    %2 = arith.cmpi ne, %1, %c0_i32_0 : i32
    scf.if %2 {
      %cst_10 = arith.constant 0.000000e+00 : f32
      %16 = vector.broadcast %cst_10 : f32 to vector<8x128xf32>
      %c0_11 = arith.constant 0 : index
      %c0_12 = arith.constant 0 : index
      %17 = vector.load %arg12[%c0_11, %c0_12] : memref<8x128xf32, #tpu.memory_space<vmem>>, vector<8x128xf32>
      tpu.vector_store %arg12[%c0_11, %c0_12], %16 {strides = array<i32>} : memref<8x128xf32, #tpu.memory_space<vmem>>, vector<8x128xf32>,
    } else {
    }
    %c0 = arith.constant 0 : index
    %c0_1 = arith.constant 0 : index
    %3 = vector.load %arg1[%c0, %c0_1] : memref<8x128xf32, #tpu.memory_space<vmem>>, vector<8x128xf32>
    %cst = arith.constant 1.000000e+00 : f32
    %4 = vector.broadcast %cst : f32 to vector<8x128xf32>
    %5 = arith.addf %4, %3 : vector<8x128xf32>
    %6 = math.log %5 : vector<8x128xf32>
    %c0_2 = arith.constant 0 : index
    %c0_3 = arith.constant 0 : index
    %7 = vector.load %arg12[%c0_2, %c0_3] : memref<8x128xf32, #tpu.memory_space<vmem>>, vector<8x128xf32>
    %8 = arith.truncf %6 : vector<8x128xf32> to vector<8x128xbf16>
    %c0_4 = arith.constant 0 : index
    %c0_5 = arith.constant 0 : index
    %9 = vector.load %arg2[%c0_4, %c0_5] : memref<128x128xbf16, #tpu.memory_space<vmem>>, vector<128x128xbf16>
    %cst_6 = arith.constant dense<0.000000e+00> : vector<8x128xf32>
    %10 = tpu.matmul %8, %9, %cst_6 {dimension_numbers = #tpu.dot_dimension_numbers<[1], [0], [0], [1], [0, 0, 1, 1], [], []>} : vector<8x128xbf16>, vector<128x128xbf16>, vector<8x128xf32> -> vector<8x128xf32>
    %11 = arith.addf %7, %10 : vector<8x128xf32>
    %c0_7 = arith.constant 0 : index
    %c0_8 = arith.constant 0 : index
    %12 = vector.load %arg12[%c0_7, %c0_8] : memref<8x128xf32, #tpu.memory_space<vmem>>, vector<8x128xf32>
    tpu.vector_store %arg12[%c0_7, %c0_8], %11 {strides = array<i32>} : memref<8x128xf32, #tpu.memory_space<vmem>>, vector<8x128xf32>,
    %c2_i32 = arith.constant 2 : i32
    %13 = arith.cmpi eq, %arg0, %c2_i32 : i32
    %14 = arith.extui %13 : i1 to i32
    %c0_i32_9 = arith.constant 0 : i32
    %15 = arith.cmpi ne, %14, %c0_i32_9 : i32
    scf.if %15 {
      %c0_10 = arith.constant 0 : index
      %c0_11 = arith.constant 0 : index
      %16 = vector.load %arg12[%c0_10, %c0_11] : memref<8x128xf32, #tpu.memory_space<vmem>>, vector<8x128xf32>
      %17 = vector.extract_strided_slice %16 {offsets = [0, 0], sizes = [1, 128], strides = [1, 1]} : vector<8x128xf32> to vector<1x128xf32>
      %18 = vector.broadcast %17 : vector<1x128xf32> to vector<8x128xf32>
      %19 = arith.subf %16, %18 : vector<8x128xf32>
      %cst_12 = arith.constant dense<0.000000e+00> : vector<128xf32>
      %20 = vector.multi_reduction <add>, %19, %cst_12 [0] : vector<8x128xf32> to vector<128xf32>
      %21 = vector.shape_cast %20 : vector<128xf32> to vector<1x128xf32>
      %cst_13 = arith.constant 1.250000e-01 : f32
      %22 = vector.broadcast %cst_13 : f32 to vector<1x128xf32>
      %23 = arith.mulf %21, %22 : vector<1x128xf32>
      %24 = arith.mulf %19, %19 : vector<8x128xf32>
      %cst_14 = arith.constant dense<0.000000e+00> : vector<128xf32>
      %25 = vector.multi_reduction <add>, %24, %cst_14 [0] : vector<8x128xf32> to vector<128xf32>
      %26 = vector.shape_cast %25 : vector<128xf32> to vector<1x128xf32>
      %cst_15 = arith.constant 1.250000e-01 : f32
      %27 = vector.broadcast %cst_15 : f32 to vector<1x128xf32>
      %28 = arith.mulf %26, %27 : vector<1x128xf32>
      %29 = arith.mulf %23, %23 : vector<1x128xf32>
      %30 = arith.subf %28, %29 : vector<1x128xf32>
      %cst_16 = arith.constant 0.000000e+00 : f32
      %31 = vector.broadcast %cst_16 : f32 to vector<1x128xf32>
      %32 = arith.maximumf %30, %31 : vector<1x128xf32>
      %33 = arith.addf %17, %23 : vector<1x128xf32>
      %c0_17 = arith.constant 0 : index
      %c0_18 = arith.constant 0 : index
      %34 = vector.load %arg3[%c0_17, %c0_18] : memref<1x128xf32, #tpu.memory_space<vmem>>, vector<1x128xf32>
      %cst_19 = arith.constant 9.99999974E-6 : f32
      %35 = vector.broadcast %cst_19 : f32 to vector<1x128xf32>
      %36 = arith.addf %32, %35 : vector<1x128xf32>
      %37 = math.rsqrt %36 : vector<1x128xf32>
      %38 = arith.mulf %34, %37 : vector<1x128xf32>
      %c0_20 = arith.constant 0 : index
      %c0_21 = arith.constant 0 : index
      %39 = vector.load %arg4[%c0_20, %c0_21] : memref<1x128xf32, #tpu.memory_space<vmem>>, vector<1x128xf32>
      %40 = arith.mulf %33, %38 : vector<1x128xf32>
      %41 = arith.subf %39, %40 : vector<1x128xf32>
      %42 = vector.broadcast %38 : vector<1x128xf32> to vector<8x128xf32>
      %43 = arith.mulf %16, %42 : vector<8x128xf32>
      %44 = vector.broadcast %41 : vector<1x128xf32> to vector<8x128xf32>
      %45 = arith.addf %43, %44 : vector<8x128xf32>
      %cst_22 = arith.constant 0.000000e+00 : f32
      %46 = vector.broadcast %cst_22 : f32 to vector<8x128xf32>
      %47 = arith.maximumf %45, %46 : vector<8x128xf32>
      %48 = arith.truncf %47 : vector<8x128xf32> to vector<8x128xbf16>
      %c0_23 = arith.constant 0 : index
      %c0_24 = arith.constant 0 : index
      %49 = vector.load %arg5[%c0_23, %c0_24] : memref<128x128xbf16, #tpu.memory_space<vmem>>, vector<128x128xbf16>
      %cst_25 = arith.constant dense<0.000000e+00> : vector<8x128xf32>
      %50 = tpu.matmul %48, %49, %cst_25 {dimension_numbers = #tpu.dot_dimension_numbers<[1], [0], [0], [1], [0, 0, 1, 1], [], []>} : vector<8x128xbf16>, vector<128x128xbf16>, vector<8x128xf32> -> vector<8x128xf32>
      %51 = vector.extract_strided_slice %50 {offsets = [0, 0], sizes = [1, 128], strides = [1, 1]} : vector<8x128xf32> to vector<1x128xf32>
      %52 = vector.broadcast %51 : vector<1x128xf32> to vector<8x128xf32>
      %53 = arith.subf %50, %52 : vector<8x128xf32>
      %cst_26 = arith.constant dense<0.000000e+00> : vector<128xf32>
      %54 = vector.multi_reduction <add>, %53, %cst_26 [0] : vector<8x128xf32> to vector<128xf32>
      %55 = vector.shape_cast %54 : vector<128xf32> to vector<1x128xf32>
      %cst_27 = arith.constant 1.250000e-01 : f32
      %56 = vector.broadcast %cst_27 : f32 to vector<1x128xf32>
      %57 = arith.mulf %55, %56 : vector<1x128xf32>
      %58 = arith.mulf %53, %53 : vector<8x128xf32>
      %cst_28 = arith.constant dense<0.000000e+00> : vector<128xf32>
      %59 = vector.multi_reduction <add>, %58, %cst_28 [0] : vector<8x128xf32> to vector<128xf32>
      %60 = vector.shape_cast %59 : vector<128xf32> to vector<1x128xf32>
      %cst_29 = arith.constant 1.250000e-01 : f32
      %61 = vector.broadcast %cst_29 : f32 to vector<1x128xf32>
      %62 = arith.mulf %60, %61 : vector<1x128xf32>
      %63 = arith.mulf %57, %57 : vector<1x128xf32>
      %64 = arith.subf %62, %63 : vector<1x128xf32>
      %cst_30 = arith.constant 0.000000e+00 : f32
      %65 = vector.broadcast %cst_30 : f32 to vector<1x128xf32>
      %66 = arith.maximumf %64, %65 : vector<1x128xf32>
      %67 = arith.addf %51, %57 : vector<1x128xf32>
      %c0_31 = arith.constant 0 : index
      %c0_32 = arith.constant 0 : index
      %68 = vector.load %arg6[%c0_31, %c0_32] : memref<1x128xf32, #tpu.memory_space<vmem>>, vector<1x128xf32>
      %cst_33 = arith.constant 9.99999974E-6 : f32
      %69 = vector.broadcast %cst_33 : f32 to vector<1x128xf32>
      %70 = arith.addf %66, %69 : vector<1x128xf32>
      %71 = math.rsqrt %70 : vector<1x128xf32>
      %72 = arith.mulf %68, %71 : vector<1x128xf32>
      %c0_34 = arith.constant 0 : index
      %c0_35 = arith.constant 0 : index
      %73 = vector.load %arg7[%c0_34, %c0_35] : memref<1x128xf32, #tpu.memory_space<vmem>>, vector<1x128xf32>
      %74 = arith.mulf %67, %72 : vector<1x128xf32>
      %75 = arith.subf %73, %74 : vector<1x128xf32>
      %76 = vector.broadcast %72 : vector<1x128xf32> to vector<8x128xf32>
      %77 = arith.mulf %50, %76 : vector<8x128xf32>
      %78 = vector.broadcast %75 : vector<1x128xf32> to vector<8x128xf32>
      %79 = arith.addf %77, %78 : vector<8x128xf32>
      %cst_36 = arith.constant 0.000000e+00 : f32
      %80 = vector.broadcast %cst_36 : f32 to vector<8x128xf32>
      %81 = arith.maximumf %79, %80 : vector<8x128xf32>
      %82 = arith.truncf %81 : vector<8x128xf32> to vector<8x128xbf16>
      %c0_37 = arith.constant 0 : index
      %c0_38 = arith.constant 0 : index
      %83 = vector.load %arg8[%c0_37, %c0_38] : memref<128x256xbf16, #tpu.memory_space<vmem>>, vector<128x256xbf16>
      %cst_39 = arith.constant dense<0.000000e+00> : vector<8x256xf32>
      %84 = tpu.matmul %82, %83, %cst_39 {dimension_numbers = #tpu.dot_dimension_numbers<[1], [0], [0], [1], [0, 0, 1, 1], [], []>} : vector<8x128xbf16>, vector<128x256xbf16>, vector<8x256xf32> -> vector<8x256xf32>
      %85 = vector.extract_strided_slice %84 {offsets = [0, 0], sizes = [1, 256], strides = [1, 1]} : vector<8x256xf32> to vector<1x256xf32>
      %86 = vector.broadcast %85 : vector<1x256xf32> to vector<8x256xf32>
      %87 = arith.subf %84, %86 : vector<8x256xf32>
      %cst_40 = arith.constant dense<0.000000e+00> : vector<256xf32>
      %88 = vector.multi_reduction <add>, %87, %cst_40 [0] : vector<8x256xf32> to vector<256xf32>
      %89 = vector.shape_cast %88 : vector<256xf32> to vector<1x256xf32>
      %cst_41 = arith.constant 1.250000e-01 : f32
      %90 = vector.broadcast %cst_41 : f32 to vector<1x256xf32>
      %91 = arith.mulf %89, %90 : vector<1x256xf32>
      %92 = arith.mulf %87, %87 : vector<8x256xf32>
      %cst_42 = arith.constant dense<0.000000e+00> : vector<256xf32>
      %93 = vector.multi_reduction <add>, %92, %cst_42 [0] : vector<8x256xf32> to vector<256xf32>
      %94 = vector.shape_cast %93 : vector<256xf32> to vector<1x256xf32>
      %cst_43 = arith.constant 1.250000e-01 : f32
      %95 = vector.broadcast %cst_43 : f32 to vector<1x256xf32>
      %96 = arith.mulf %94, %95 : vector<1x256xf32>
      %97 = arith.mulf %91, %91 : vector<1x256xf32>
      %98 = arith.subf %96, %97 : vector<1x256xf32>
      %cst_44 = arith.constant 0.000000e+00 : f32
      %99 = vector.broadcast %cst_44 : f32 to vector<1x256xf32>
      %100 = arith.maximumf %98, %99 : vector<1x256xf32>
      %101 = arith.addf %85, %91 : vector<1x256xf32>
      %c0_45 = arith.constant 0 : index
      %c0_46 = arith.constant 0 : index
      %102 = vector.load %arg9[%c0_45, %c0_46] : memref<1x256xf32, #tpu.memory_space<vmem>>, vector<1x256xf32>
      %cst_47 = arith.constant 9.99999974E-6 : f32
      %103 = vector.broadcast %cst_47 : f32 to vector<1x256xf32>
      %104 = arith.addf %100, %103 : vector<1x256xf32>
      %105 = math.rsqrt %104 : vector<1x256xf32>
      %106 = arith.mulf %102, %105 : vector<1x256xf32>
      %c0_48 = arith.constant 0 : index
      %c0_49 = arith.constant 0 : index
      %107 = vector.load %arg10[%c0_48, %c0_49] : memref<1x256xf32, #tpu.memory_space<vmem>>, vector<1x256xf32>
      %108 = arith.mulf %101, %106 : vector<1x256xf32>
      %109 = arith.subf %107, %108 : vector<1x256xf32>
      %110 = vector.broadcast %106 : vector<1x256xf32> to vector<8x256xf32>
      %111 = arith.mulf %84, %110 : vector<8x256xf32>
      %112 = vector.broadcast %109 : vector<1x256xf32> to vector<8x256xf32>
      %113 = arith.addf %111, %112 : vector<8x256xf32>
      %114 = vector.extract_strided_slice %113 {offsets = [0, 0], sizes = [8, 128], strides = [1, 1]} : vector<8x256xf32> to vector<8x128xf32>
      %c0_50 = arith.constant 0 : index
      %c0_51 = arith.constant 0 : index
      %115 = vector.load %arg11[%c0_50, %c0_51] : memref<8x256xf32, #tpu.memory_space<vmem>>, vector<8x128xf32>
      tpu.vector_store %arg11[%c0_50, %c0_51], %114 {strides = array<i32>} : memref<8x256xf32, #tpu.memory_space<vmem>>, vector<8x128xf32>,
      %116 = vector.extract_strided_slice %113 {offsets = [0, 128], sizes = [8, 128], strides = [1, 1]} : vector<8x256xf32> to vector<8x128xf32>
      %cst_52 = arith.constant 0.000000e+00 : f32
      %117 = vector.broadcast %cst_52 : f32 to vector<8x128xf32>
      %118 = arith.maximumf %116, %117 : vector<8x128xf32>
      %119 = math.absf %116 : vector<8x128xf32>
      %cst_53 = arith.constant 0.000000e+00 : f32
      %120 = vector.broadcast %cst_53 : f32 to vector<8x128xf32>
      %121 = arith.subf %120, %119 : vector<8x128xf32>
      %122 = math.exp %121 : vector<8x128xf32>
      %cst_54 = arith.constant 1.000000e+00 : f32
      %123 = vector.broadcast %cst_54 : f32 to vector<8x128xf32>
      %124 = arith.addf %123, %122 : vector<8x128xf32>
      %125 = math.log %124 : vector<8x128xf32>
      %126 = arith.addf %118, %125 : vector<8x128xf32>
      %c0_55 = arith.constant 0 : index
      %c128 = arith.constant 128 : index
      %127 = vector.load %arg11[%c0_55, %c128] : memref<8x256xf32, #tpu.memory_space<vmem>>, vector<8x128xf32>
      tpu.vector_store %arg11[%c0_55, %c128], %126 {strides = array<i32>} : memref<8x256xf32, #tpu.memory_space<vmem>>, vector<8x128xf32>,
    } else {
    }
    return
  }
  func.func @transform_0(%arg0: i32) -> (i32, i32) {
    %c0_i32 = arith.constant 0 : i32
    %c0_i32_0 = arith.constant 0 : i32
    return %c0_i32, %arg0 : i32, i32
  }
  func.func @transform_1(%arg0: i32) -> (i32, i32) {
    %c0_i32 = arith.constant 0 : i32
    %c0_i32_0 = arith.constant 0 : i32
    return %arg0, %c0_i32 : i32, i32
  }
  func.func @transform_2(%arg0: i32) -> (i32, i32) {
    %c0_i32 = arith.constant 0 : i32
    %c0_i32_0 = arith.constant 0 : i32
    %c0_i32_1 = arith.constant 0 : i32
    return %c0_i32, %c0_i32_0 : i32, i32
  }
  func.func @transform_3(%arg0: i32) -> (i32, i32) {
    %c0_i32 = arith.constant 0 : i32
    %c0_i32_0 = arith.constant 0 : i32
    %c0_i32_1 = arith.constant 0 : i32
    return %c0_i32, %c0_i32_0 : i32, i32
  }
  func.func @transform_4(%arg0: i32) -> (i32, i32) {
    %c0_i32 = arith.constant 0 : i32
    %c0_i32_0 = arith.constant 0 : i32
    %c0_i32_1 = arith.constant 0 : i32
    return %c0_i32, %c0_i32_0 : i32, i32
  }
  func.func @transform_5(%arg0: i32) -> (i32, i32) {
    %c0_i32 = arith.constant 0 : i32
    %c0_i32_0 = arith.constant 0 : i32
    %c0_i32_1 = arith.constant 0 : i32
    return %c0_i32, %c0_i32_0 : i32, i32
  }
  func.func @transform_6(%arg0: i32) -> (i32, i32) {
    %c0_i32 = arith.constant 0 : i32
    %c0_i32_0 = arith.constant 0 : i32
    %c0_i32_1 = arith.constant 0 : i32
    return %c0_i32, %c0_i32_0 : i32, i32
  }
  func.func @transform_7(%arg0: i32) -> (i32, i32) {
    %c0_i32 = arith.constant 0 : i32
    %c0_i32_0 = arith.constant 0 : i32
    %c0_i32_1 = arith.constant 0 : i32
    return %c0_i32, %c0_i32_0 : i32, i32
  }
  func.func @transform_8(%arg0: i32) -> (i32, i32) {
    %c0_i32 = arith.constant 0 : i32
    %c0_i32_0 = arith.constant 0 : i32
    %c0_i32_1 = arith.constant 0 : i32
    return %c0_i32, %c0_i32_0 : i32, i32
  }
  func.func @transform_9(%arg0: i32) -> (i32, i32) {
    %c0_i32 = arith.constant 0 : i32
    %c0_i32_0 = arith.constant 0 : i32
    %c0_i32_1 = arith.constant 0 : i32
    return %c0_i32, %c0_i32_0 : i32, i32
  }
  func.func @transform_10(%arg0: i32) -> (i32, i32) {
    %c0_i32 = arith.constant 0 : i32
    %c0_i32_0 = arith.constant 0 : i32
    %c0_i32_1 = arith.constant 0 : i32
    return %c0_i32, %c0_i32_0 : i32, i32
  }
}

</mosaic_0001>

<bundles_post_ra>
// kernel: tpu_custom_call.1
= control target key start
LH: loop header
LB: loop body
LE: loop exit
PB: predicated region body
PF: predicated region fallthrough
CT: control target
= control target key end

     0   :  { %s1943_s0 = inlined_call_operand.hbm [shape: f32[8,384], index: 0, kind: input, shape index: {}]   ;;  %s1944_s1 = inlined_call_operand.hbm [shape: bf16[384,128], index: 1, kind: input, shape index: {}]   ;;  %s1945_s2 = inlined_call_operand.vmem [shape: f32[1,128], index: 2, kind: input, shape index: {}]   ;;  %s1946_s3 = inlined_call_operand.vmem [shape: f32[1,128], index: 3, kind: input, shape index: {}]   ;;  %s1947_s4 = inlined_call_operand.hbm [shape: bf16[128,128], index: 4, kind: input, shape index: {}]   ;;  %s1948_s5 = inlined_call_operand.vmem [shape: f32[1,128], index: 5, kind: input, shape index: {}]   ;;  %s1949_s6 = inlined_call_operand.vmem [shape: f32[1,128], index: 6, kind: input, shape index: {}]   ;;  %s1950_s7 = inlined_call_operand.hbm [shape: bf16[128,256], index: 7, kind: input, shape index: {}]   ;;  %s1951_s8 = inlined_call_operand.vmem [shape: f32[1,256], index: 8, kind: input, shape index: {}]   ;;  %s1952_s9 = inlined_call_operand.vmem [shape: f32[1,256], index: 9, kind: input, shape index: {}]   ;;  %s1953_s10 = inlined_call_operand.hbm [shape: f32[8,256], index: 10, kind: output, shape index: {}]  }
   0x1   :  { %1959 = sst [smem:[#allocation17_spill]] %s1943_s0 }
   0x2   :  { %1960 = sst [smem:[#allocation18_spill]] %s1947_s4 }
   0x3   :  { %1961 = sst [smem:[#allocation19_spill]] %s1950_s7 }
   0x4   :  { %15 = vsyncpa [#allocation4], 0 }
   0x5   :  { %17 = vsyncpa [#allocation4 + $0x1], 0 }
   0x6   :  { %18 = vsyncpa [#allocation7], 0 }
   0x7   :  { %20 = vsyncpa [#allocation7 + $0x1], 0 }
   0x8   :  { %21 = vsyncpa [#allocation10], 0 }
   0x9   :  { %22 = vsyncpa [#allocation5], 0  ;;  %s1635_s13 = smov 0   ;;  %s1637_s14 = smov 0  }
   0xa   :  { %s1639_s15 = smov 0   ;;  %s1641_s16 = smov 0  }
   0xb LB: > { %s1654_s17 = sadd.s32 4294967295, %s1562_s16   ;;  %p48_p0 = scmp.ne.s32.totalorder %s1554_s14, %s1550_s13  ;;  %s1562_s16 = sphi %s1641_s16, %s1982_s16   ;;  %s1558_s15 = sphi %s1639_s15, %s1981_s15   ;;  %s1554_s14 = sphi %s1637_s14, %s1980_s14   ;;  %s1550_s13 = sphi %s1635_s13, %s1979_s13  }
   0xc   : > { %p1954_p1 = scmp.eq.s32.totalorder %s1654_s17, 0  ;;  %p1122_p2 = scmp.ge.s32.totalorder %s1562_s16, 1 }
   0xd   : > { %p274_p3 = scmp.lt.s32.totalorder %s1562_s16, 4  ;;  %s1564_s20 = smov [#allocation8]  }
   0xe   : > { %p1663_p5 = por %p1954_p1, %p48_p0  ;;  %s292_s21 = sshll.u32 %s1564_s20, 4  ;;  %s293_s21 = int_to_ptr.vmem [resolvable:$true] %s292_s21 }
   0xf   : > { %p1667_p6 = pnand %p1122_p2, %p274_p3  ;;  %s1565_s23 = smov [#allocation9]  }
  0x10   : > { %s1962_s18 = scalar_select %p1663_p5, 1, 0 }
  0x11   : > { %s1963_s19 = scalar_select %p1667_p6, 1, 0 }
  0x12   : > { %p1249_p7 = pneg %p1667_p6  ;;  %s311_s24 = sshll.u32 %s1565_s23, 4  ;;  %s1679_s24 = int_to_ptr.vmem [resolvable:$true] %s311_s24 }
  0x13   : > { %s1965_s4 = sld [smem:[#allocation18_spill]] }
  0x14   : > { %p1675_p8 = pnand %p1249_p7, %p1954_p1 }
  0x16   : > { %p1372_p10 = pneg %p1675_p8 }
  0x19   : > { %s1370_s27 = scalar_lea.hbm %s1965_s4, 1024 }
  0x1a   : > { %p1371_p9 = scmp.ne.s32.totalorder %s1965_s4, %s1370_s27  ;;  %p1377_p13 = scmp.lt.u32.totalorder %s1370_s27, %s1965_s4 }
  0x1c   : > { %p1373_p11 = pnand %p1372_p10, %p1371_p9 }
  0x1e   : > { %p1374_p12 = pneg %p1373_p11 }
  0x20   : > { %p1379_p0 = pnand %p1377_p13, %p1374_p12 }
  0x22   : > { %1382 = shalt.err (!%p1379_p0)
}
  0x23   : > { %s1383_s12 = scalar_lea.vmem %s293_s21, 1024  ;;  %p1391_p4 = scmp.lt.s32.totalorder %s293_s21, %s293_s21 }
  0x24   : > { %p1384_p2 = scmp.ne.s32.totalorder %s293_s21, %s1383_s12  ;;  %p1392_p1 = scmp.lt.s32.totalorder %s1383_s12, %s1383_s12 }
  0x26   : > { %p1386_p3 = pnand %p1384_p2, %p1372_p10  ;;  %p1393_p5 = por %p1392_p1, %p1391_p4 }
  0x28   : > { %p1387_p7 = pneg %p1386_p3 }
  0x2a   : > { %p1394_p6 = pnand %p1393_p5, %p1387_p7 }
  0x2c   : > { %1397 = shalt.err (!%p1394_p6)
}
  0x2d   : > { %s1957_s13 = smov 64   ;;  %s1958_s20 = smov 4  }
  0x2e   : > { %1252 = dma.hbm_to_vmem [thread:$0]  (!%p1675_p8), %s1965_s4, 1024, %s293_s21, [#allocation7], %s1957_s13, %s1957_s13, %s1958_s20  }
  0x2f   : > { %s1966_s7 = sld [smem:[#allocation19_spill]] }
  0x35   : > { %s1398_s28 = scalar_lea.hbm %s1966_s7, 2048 }
  0x36   : > { %p1399_p1 = scmp.ne.s32.totalorder %s1966_s7, %s1398_s28  ;;  %p1405_p6 = scmp.lt.u32.totalorder %s1398_s28, %s1966_s7 }
  0x38   : > { %p1401_p4 = pnand %p1399_p1, %p1372_p10 }
  0x3a   : > { %p1402_p5 = pneg %p1401_p4 }
  0x3c   : > { %p1407_p9 = pnand %p1405_p6, %p1402_p5 }
  0x3e   : > { %1410 = shalt.err (!%p1407_p9)
}
  0x3f   : > { %s1411_s21 = scalar_lea.vmem %s1679_s24, 2048  ;;  %p1419_p0 = scmp.lt.s32.totalorder %s1679_s24, %s1679_s24 }
  0x40   : > { %p1412_p11 = scmp.ne.s32.totalorder %s1679_s24, %s1411_s21  ;;  %p1420_p2 = scmp.lt.s32.totalorder %s1411_s21, %s1411_s21 }
  0x42   : > { %p1414_p12 = pnand %p1412_p11, %p1372_p10  ;;  %p1421_p3 = por %p1420_p2, %p1419_p0 }
  0x44   : > { %p1415_p13 = pneg %p1414_p12 }
  0x46   : > { %p1422_p7 = pnand %p1421_p3, %p1415_p13 }
  0x48   : > { %1425 = shalt.err (!%p1422_p7)
}
  0x49   : > { %s1568_s23 = smov 128   ;;  %s1569_s25 = smov 8  }
  0x4a   : > { %1255 = dma.hbm_to_vmem [thread:$0]  (!%p1675_p8), %s1966_s7, 2048, %s1679_s24, [#allocation10], %s1568_s23, %s1568_s23, %s1569_s25  }
  0x4b   : > { %s1732_s28 = sadd.s32 1, %s1562_s16   ;;  %s35_s30 = sadd.s32 1, %s1558_s15 }
  0x4c   : > { %s32_s29 = ssub.s32 %s1562_s16, %s1732_s28  ;;  %p42_p1 = scmp.ne.s32.totalorder %s1558_s15, %s1554_s14 }
  0x4d   : > { %p33_p10 = scmp.eq.s32.totalorder %s32_s29, 0  ;;  %p43_p4 = scmp.eq.s32.totalorder %s1562_s16, 0 }
  0x4e   : > { %p1265_p6 = scmp.lt.s32.totalorder %s1562_s16, 3  ;;  %s1745_s12 = sand.u32 1, %s1558_s15  }
  0x4f   : > { %s1741_s11 = scalar_select %p33_p10, %s1558_s15, %s35_s30  }
  0x50   : > { %p44_p5 = por %p43_p4, %p42_p1  ;;  %s1127_s22 = sshll.u32 %s1562_s16, 7 }
  0x51   : > { %s1126_s21 = sshll.u32 %s1745_s12, 3  ;;  %s1967_s0 = sld [smem:[#allocation17_spill]] }
  0x52   : > { %s335_s26 = scalar_lea.vmem [#allocation3], %s1126_s21  ;;  %p1754_p8 = pnand %p1265_p6, %p44_p5 }
  0x53   : > { %s342_s27 = sshll.u32 %s335_s26, 4  ;;  %s332_s13 = scalar_lea.sflag [#allocation4], %s1745_s12  ;;  %s1758_s27 = int_to_ptr.vmem [resolvable:$true] %s342_s27 }
  0x54   : > { %p1428_p11 = pneg %p1754_p8 }
  0x57   : > { %s1752_s25 = scalar_lea.hbm %s1967_s0, %s1127_s22  ;;  %s1431_s24 = scalar_lea.hbm %s1967_s0, 384 }
  0x58   : > { %s1426_s20 = scalar_lea.hbm %s1752_s25, 128  ;;  %p1432_p0 = scmp.lt.u32.totalorder %s1752_s25, %s1967_s0 }
  0x59   : > { %p1427_p9 = scmp.ne.s32.totalorder %s1752_s25, %s1426_s20  ;;  %p1433_p2 = scmp.lt.u32.totalorder %s1431_s24, %s1426_s20 }
  0x5a   : > { %p1435_p7 = scmp.lt.u32.totalorder %s1426_s20, %s1752_s25 }
  0x5b   : > { %p1429_p12 = pnand %p1428_p11, %p1427_p9  ;;  %p1434_p3 = por %p1433_p2, %p1432_p0 }
  0x5d   : > { %p1430_p13 = pneg %p1429_p12  ;;  %p1436_p10 = por %p1435_p7, %p1434_p3 }
  0x5f   : > { %p1437_p1 = pnand %p1436_p10, %p1430_p13 }
  0x61   : > { %1440 = shalt.err (!%p1437_p1)
}
  0x62   : > { %s1441_s30 = scalar_lea.vmem %s1758_s27, 128  ;;  %s1570_s22 = smov [#allocation3]  }
  0x63   : > { %p1442_p4 = scmp.ne.s32.totalorder %s1758_s27, %s1441_s30  ;;  %s1446_s21 = sshll.u32 %s1570_s22, 4  ;;  %s1447_s21 = int_to_ptr.vmem [resolvable:$false] %s1446_s21 }
  0x64   : > { %s1448_s23 = scalar_lea.vmem %s1447_s21, 256  ;;  %p1449_p9 = scmp.lt.s32.totalorder %s1758_s27, %s1447_s21 }
  0x65   : > { %p1444_p5 = pnand %p1442_p4, %p1428_p11  ;;  %p1450_p12 = scmp.lt.s32.totalorder %s1448_s23, %s1441_s30 }
  0x67   : > { %p1445_p6 = pneg %p1444_p5  ;;  %p1451_p0 = por %p1450_p12, %p1449_p9 }
  0x69   : > { %p1452_p2 = pnand %p1451_p0, %p1445_p6 }
  0x6b   : > { %1455 = shalt.err (!%p1452_p2)
}
  0x6c   : > { %1259 = dma.hbm_to_vmem [thread:$0]  (!%p1754_p8), %s1752_s25, 128, %s1758_s27, %s332_s13  }
  0x6d   : > { %s1969_s20 = sshll.u32 %s1745_s12, 6  ;;  %s349_s22 = sand.u32 1, %s1562_s16  }
  0x6e   : > { %s353_s24 = scalar_lea.vmem [#allocation6], %s1969_s20  ;;  %s1174_s21 = sshll.u32 %s1562_s16, 10 }
  0x6f   : > { %s360_s26 = sshll.u32 %s353_s24, 4  ;;  %s1796_s0 = scalar_lea.hbm %s1944_s1, %s1174_s21  ;;  %s1790_s26 = int_to_ptr.vmem [resolvable:$true] %s360_s26 }
  0x70   : > { %s1798_s4 = scalar_lea.sflag [#allocation7], %s349_s22  ;;  %s1456_s7 = scalar_lea.hbm %s1796_s0, 1024 }
  0x71   : > { %p1457_p13 = scmp.ne.s32.totalorder %s1796_s0, %s1456_s7  ;;  %s1461_s16 = scalar_lea.hbm %s1944_s1, 3072 }
  0x72   : > { %p1462_p10 = scmp.lt.u32.totalorder %s1796_s0, %s1944_s1  ;;  %p1463_p1 = scmp.lt.u32.totalorder %s1461_s16, %s1456_s7 }
  0x73   : > { %p1459_p3 = pnand %p1457_p13, %p1428_p11  ;;  %p1465_p5 = scmp.lt.u32.totalorder %s1456_s7, %s1796_s0 }
  0x74   : > { %p1464_p4 = por %p1463_p1, %p1462_p10 }
  0x75   : > { %p1460_p7 = pneg %p1459_p3 }
  0x76   : > { %p1466_p6 = por %p1465_p5, %p1464_p4 }
  0x78   : > { %p1467_p9 = pnand %p1466_p6, %p1460_p7 }
  0x7a   : > { %1470 = shalt.err (!%p1467_p9)
}
  0x7b   : > { %s1471_s20 = scalar_lea.vmem %s1790_s26, 1024  ;;  %s1571_s24 = smov [#allocation6]  }
  0x7c   : > { %p1472_p12 = scmp.ne.s32.totalorder %s1790_s26, %s1471_s20  ;;  %s1476_s22 = sshll.u32 %s1571_s24, 4  ;;  %s1477_s22 = int_to_ptr.vmem [resolvable:$false] %s1476_s22 }
  0x7d   : > { %s1478_s21 = scalar_lea.vmem %s1477_s22, 2048  ;;  %p1479_p13 = scmp.lt.s32.totalorder %s1790_s26, %s1477_s22 }
  0x7e   : > { %p1474_p0 = pnand %p1472_p12, %p1428_p11  ;;  %p1480_p3 = scmp.lt.s32.totalorder %s1478_s21, %s1471_s20 }
  0x80   : > { %p1475_p2 = pneg %p1474_p0  ;;  %p1481_p10 = por %p1480_p3, %p1479_p13 }
  0x82   : > { %p1482_p1 = pnand %p1481_p10, %p1475_p2 }
  0x84   : > { %1485 = shalt.err (!%p1482_p1)
}
  0x85   : > { %s1970_s7 = smov 4   ;;  %s1971_s30 = smov 64  }
  0x86   : > { %1262 = dma.hbm_to_vmem [thread:$0]  (!%p1754_p8), %s1796_s0, 1024, %s1790_s26, %s1798_s4, %s1971_s30, %s1971_s30, %s1970_s7  }
  0x87   : > { %p1972_p11 = scmp.ne.s32.totalorder %s1963_s19, 0 }
  0x88   : > { %s374_s23 = sand.u32 (!%p1972_p11), 1, %s1554_s14   ;;  %p1973_p7 = scmp.ne.s32.totalorder (!%p1972_p11), %s1962_s18, 0 }
  0x89   : > { %372 = sbr.rel (%p1972_p11) target bundleno = 1067 (0x42b), region = 60  ;;  %s1132_s13 = sshll.u32 (!%p1972_p11), %s374_s23, 3 }
  0x8a   : > { %s375_s12 = scalar_lea.sflag (!%p1972_p11), [#allocation4], %s374_s23  ;;  %s378_s16 = scalar_lea.vmem (!%p1972_p11), [#allocation3], %s1132_s13 }
  0x90   : > { %1529 = dma.done.wait (%p1973_p7), %s375_s12, 128  }
  0x91   : > { %1531 = vsyncadd (%p1973_p7), %s375_s12, 4294967168  ;;  %s383_s29 = sand.u32 1, %s1654_s17   ;;  %s1133_s25 = sshll.u32 %s374_s23, 6 }
  0x92   : > { %s384_s27 = scalar_lea.sflag [#allocation7], %s383_s29  ;;  %s1835_s0 = scalar_lea.vmem [#allocation6], %s1133_s25 }
  0x93   : > { %1533 = dma.done.wait (%p1973_p7), %s384_s27, 1024  }
  0x94   : > { %1535 = vsyncadd (%p1973_p7), %s384_s27, 4294966272  ;;  %p1974_p8 = scmp.eq.s32.totalorder %s1654_s17, 0 }
  0x96   : > { %1537 = dma.done.wait (%p1974_p8), [#allocation7], 1024   ;;  %p1975_p4 = pmov %p1974_p8 }
  0x98   : > { %1539 = vsyncadd (%p1975_p4), [#allocation7], 4294966272  ;;  %p1976_p5 = pmov %p1975_p4 }
  0x99   : > { %p1977_p6 = pmov %p1975_p4 }
  0x9a   : > { %1541 = dma.done.wait (%p1976_p5), [#allocation10], 2048  }
  0x9b   : > { %1543 = vsyncadd (%p1977_p6), [#allocation10], 4294965248  ;;  %p1978_p9 = scmp.ne.s32.totalorder %s1654_s17, 0 }
  0x9c   : > { %v1572_v0 = vmov (!%p1978_p9), 0.0  }
  0x9d   : > { %437 = sbr.rel (%p1978_p9) target bundleno = 164 (0xa4), region = 80  ;;  %438 = vst [vmem:[#allocation2] sm:$0xff] (!%p1978_p9), %v1572_v0 }
  0xa4 PF: > { %v1316_v1 = vld [vmem:[%s1835_s0] sm:$0xff]   ;;  %v1573_v2 = vmov 0.0   ;;  %v1317_v3 = vld [vmem:[%s1835_s0 + $0x8] sm:$0xff]   ;;  %vm1574_vm0 = vmmov 0   ;;  %v1318_v4 = vld [vmem:[%s1835_s0 + $0x10] sm:$0xff]   ;;  %p1145_p12 = scmp.ne.s32.totalorder %s1654_s17, 2 }
  0xa5   : > { %1193 = vmatprep.subr.bf16.mxu0 %v1573_v2  ;;  %1209 = vmatprep.mubr.msk.bf16.mxu0 %vm1574_vm0, %v1573_v2  ;;  %v439_v5 = vld [vmem:[%s378_s16] sm:$0xff]  ;;  %v1320_v8 = vld [vmem:[%s1835_s0 + $0x20] sm:$0xff]   ;;  %v1321_v9 = vld [vmem:[%s1835_s0 + $0x28] sm:$0xff]   ;;  %v556_v22 = vlaneseq (!%p1145_p12)  ;;  %v1575_v23 = vmov (!%p1145_p12), 0.0   ;;  %vm1576_vm1 = vmmov (!%p1145_p12), 0  }
  0xa6   : > { %1194 = vmatpush3.bf16.msra.mxu0 %v1316_v1  ;;  %v440_v6 = vadd.f32 1.0, %v439_v5  ;;  %v1319_v7 = vld [vmem:[%s1835_s0 + $0x18] sm:$0xff]   ;;  %v1322_v11 = vld [vmem:[%s1835_s0 + $0x30] sm:$0xff]   ;;  %v443_v15 = vld [vmem:[#allocation2] sm:$0xff] }
  0xa7   : > { %1195 = vmatprep.subr.bf16.mxu0 %v1573_v2  ;;  %v1323_v13 = vld [vmem:[%s1835_s0 + $0x38] sm:$0xff]   ;;  %v1326_v21 = vld [vmem:[#allocation8] sm:$0xff] (!%p1145_p12)   ;;  %v1327_v24 = vld [vmem:[#allocation8 + $0x8] sm:$0xff] (!%p1145_p12)   ;;  %v1860_v25 = vshrl.u32 (!%p1145_p12), %v556_v22, 7 }
  0xa8   : > { %1324 = vlog2.f32 %v440_v6  ;;  %v1328_v27 = vld [vmem:[#allocation8 + $0x10] sm:$0xff] (!%p1145_p12)   ;;  %v1329_v28 = vld [vmem:[#allocation8 + $0x18] sm:$0xff] (!%p1145_p12)   ;;  %v1330_v34 = vld [vmem:[#allocation8 + $0x20] sm:$0xff] (!%p1145_p12)  }
  0xa9   : > { %v1863_v26 = vsub.s32 (!%p1145_p12), 0, %v1860_v25  ;;  %v1331_v39 = vld [vmem:[#allocation8 + $0x28] sm:$0xff] (!%p1145_p12)   ;;  %v1332_v44 = vld [vmem:[#allocation8 + $0x30] sm:$0xff] (!%p1145_p12)   ;;  %v1333_v49 = vld [vmem:[#allocation8 + $0x38] sm:$0xff] (!%p1145_p12)  }
  0xaa   : > { %1196 = vmatpush3.bf16.msra.mxu0 %v1317_v3  ;;  %v580_v55 = vld [vmem:[%s1945_s2] sm:$0x1] (!%p1145_p12)  ;;  %v1337_v6 = vld [vmem:[#allocation9 + $0x14] ss:$8 sps:$4 sm:$0xff] (!%p1145_p12)  }
  0xab   : > { %1197 = vmatprep.subr.bf16.mxu0 %v1573_v2  ;;  %v584_v59 = vld [vmem:[%s1946_s3] sm:$0x1] (!%p1145_p12) }
  0xac   : > { %v1336_v5 = vld [vmem:[#allocation9] ss:$8 sps:$4 sm:$0xff] (!%p1145_p12)  }
  0xae   : > { %1198 = vmatpush3.bf16.msra.mxu0 %v1318_v4  ;;  %v1334_v4 = vld [vmem:[#allocation9 + $0x4] ss:$8 sps:$4 sm:$0xff] (!%p1145_p12)  }
  0xaf   : > { %1199 = vmatprep.subr.bf16.mxu0 %v1573_v2  ;;  %850 = vmatprep.subr.bf16.mxu1 (!%p1145_p12), %v1334_v4 }
  0xb0   : > { %851 = vmatpush1.bf16.msra.mxu1 (!%p1145_p12), %v1336_v5 }
  0xb1   : > { %852 = vmatprep.subr.bf16.mxu1 (!%p1145_p12), %v1337_v6 }
  0xb2   : > { %1200 = vmatpush3.bf16.msra.mxu0 %v1319_v7  ;;  %v1325_v10 = vpop.eup %1324  ;;  %v1339_v7 = vld [vmem:[#allocation9 + $0x10] ss:$8 sps:$4 sm:$0xff] (!%p1145_p12)  }
  0xb3   : > { %1201 = vmatprep.subr.bf16.mxu0 %v1573_v2  ;;  %v442_v12 = vmul.f32 0.6931472, %v1325_v10  ;;  %v1343_v10 = vld [vmem:[#allocation9 + $0x34] ss:$8 sps:$4 sm:$0xff] (!%p1145_p12)  }
  0xb4   : > { %853 = vmatpush1.bf16.msra.mxu1 (!%p1145_p12), %v1339_v7 }
  0xb5   : > { %v444_v14 = vpack.c.bf16 %v442_v12, %v442_v12  ;;  %v1346_v12 = vld [vmem:[#allocation9 + $0x44] ss:$8 sps:$4 sm:$0xff] (!%p1145_p12)  }
  0xb6   : > { %1202 = vmatpush3.bf16.msra.mxu0 %v1320_v8  ;;  %v1340_v8 = vld [vmem:[#allocation9 + $0x24] ss:$8 sps:$4 sm:$0xff] (!%p1145_p12)  }
  0xb7   : > { %1203 = vmatprep.subr.bf16.mxu0 %v1573_v2  ;;  %854 = vmatprep.subr.bf16.mxu1 (!%p1145_p12), %v1340_v8 }
  0xba   : > { %1204 = vmatpush3.bf16.msra.mxu0 %v1321_v9  ;;  %v1342_v9 = vld [vmem:[#allocation9 + $0x20] ss:$8 sps:$4 sm:$0xff] (!%p1145_p12)  }
  0xbb   : > { %1205 = vmatprep.subr.bf16.mxu0 %v1573_v2  ;;  %855 = vmatpush1.bf16.msra.mxu1 (!%p1145_p12), %v1342_v9 }
  0xbc   : > { %856 = vmatprep.subr.bf16.mxu1 (!%p1145_p12), %v1343_v10 }
  0xbe   : > { %1206 = vmatpush3.bf16.msra.mxu0 %v1322_v11  ;;  %v1345_v11 = vld [vmem:[#allocation9 + $0x30] ss:$8 sps:$4 sm:$0xff] (!%p1145_p12)  }
  0xbf   : > { %1207 = vmatprep.subr.bf16.mxu0 %v1573_v2  ;;  %857 = vmatpush1.bf16.msra.mxu1 (!%p1145_p12), %v1345_v11 }
  0xc0   : > { %858 = vmatprep.subr.bf16.mxu1 (!%p1145_p12), %v1346_v12 }
  0xc2   : > { %1208 = vmatpush3.bf16.msra.mxu0 %v1323_v13  ;;  %v1348_v13 = vld [vmem:[#allocation9 + $0x40] ss:$8 sps:$4 sm:$0xff] (!%p1145_p12)  }
  0xc3   : > { %1213 = vmatprep.subr.bf16.mxu0 (!%p1145_p12), %v1575_v23  ;;  %859 = vmatpush1.bf16.msra.mxu1 (!%p1145_p12), %v1348_v13 }
  0xc5   : > { %1210 = vmatmul.mubr.bf16.vlgmr.msra.gmra.mrb[0].mxu0 %v444_v14  ;;  %v1349_v14 = vld [vmem:[#allocation9 + $0x54] ss:$8 sps:$4 sm:$0xff] (!%p1145_p12)  }
  0xc6   : > { %1214 = vmatpush3.bf16.msra.mxu0 (!%p1145_p12), %v1326_v21  ;;  %1229 = vmatprep.mubr.msk.bf16.mxu0 (!%p1145_p12), %vm1576_vm1, %v1575_v23 }
  0xc7   : > { %1215 = vmatprep.subr.bf16.mxu0 (!%p1145_p12), %v1575_v23  ;;  %860 = vmatprep.subr.bf16.mxu1 (!%p1145_p12), %v1349_v14 }
  0xca   : > { %1216 = vmatpush3.bf16.msra.mxu0 (!%p1145_p12), %v1327_v24 }
  0xcb   : > { %1217 = vmatprep.subr.bf16.mxu0 (!%p1145_p12), %v1575_v23 }
  0xce   : > { %1218 = vmatpush3.bf16.msra.mxu0 (!%p1145_p12), %v1328_v27 }
  0xcf   : > { %1219 = vmatprep.subr.bf16.mxu0 (!%p1145_p12), %v1575_v23 }
  0xd2   : > { %1220 = vmatpush3.bf16.msra.mxu0 (!%p1145_p12), %v1329_v28 }
  0xd3   : > { %1221 = vmatprep.subr.bf16.mxu0 (!%p1145_p12), %v1575_v23 }
  0xd6   : > { %1222 = vmatpush3.bf16.msra.mxu0 (!%p1145_p12), %v1330_v34 }
  0xd7   : > { %1223 = vmatprep.subr.bf16.mxu0 (!%p1145_p12), %v1575_v23 }
  0xda   : > { %1224 = vmatpush3.bf16.msra.mxu0 (!%p1145_p12), %v1331_v39 }
  0xdb   : > { %1225 = vmatprep.subr.bf16.mxu0 (!%p1145_p12), %v1575_v23 }
  0xde   : > { %1226 = vmatpush3.bf16.msra.mxu0 (!%p1145_p12), %v1332_v44 }
  0xdf   : > { %1227 = vmatprep.subr.bf16.mxu0 (!%p1145_p12), %v1575_v23 }
  0xe2   : > { %1228 = vmatpush3.bf16.msra.mxu0 (!%p1145_p12), %v1333_v49 }
 0x195   : > { %554 = sbr.rel (%p1145_p12) target bundleno = 1042 (0x412), region = 84 }
 0x198   : > { %v543_v16 = vpop.f32.mrb[0].mxu0 }
 0x199   : > { %v549_v17 = vadd.f32 %v543_v16, %v443_v15  ;;  %v1211_v18 = vpop.f32.mrb[1].mxu0  ;;  %v1351_v15 = vld [vmem:[#allocation9 + $0x50] ss:$8 sps:$4 sm:$0xff] (!%p1145_p12)   ;;  %v1352_v16 = vld [vmem:[#allocation9 + $0x64] ss:$8 sps:$4 sm:$0xff] (!%p1145_p12)  }
 0x19a   : > { %v546_v19 = vpop.f32.mrb[2].mxu0  ;;  %861 = vmatpush1.bf16.msra.mxu1 (!%p1145_p12), %v1351_v15  ;;  %v1355_v18 = vld [vmem:[#allocation9 + $0x74] ss:$8 sps:$4 sm:$0xff] (!%p1145_p12)  }
 0x19b   : > { %550 = vst [vmem:[#allocation2] sm:$0xff] %v549_v17  ;;  %v1212_v20 = vpop.f32.mrb[3].mxu0  ;;  %v1354_v17 = vld [vmem:[#allocation9 + $0x60] ss:$8 sps:$4 sm:$0xff] (!%p1145_p12)   ;;  %862 = vmatprep.subr.bf16.mxu1 (!%p1145_p12), %v1352_v16  ;;  %v1577_v19 = vmov (!%p1145_p12), 0  }
 0x19c   : > { %882 = vmatprep.mubr.bf16.mxu1 %v1577_v19  ;;  %v1357_v20 = vld [vmem:[#allocation9 + $0x70] ss:$8 sps:$4 sm:$0xff]  }
 0x19e   : > { %863 = vmatpush1.bf16.msra.mxu1 %v1354_v17 }
 0x19f   : > { %864 = vmatprep.subr.bf16.mxu1 %v1355_v18 }
 0x1a2   : > { %v555_v29 = vld [vmem:[#allocation2] sm:$0xff]  ;;  %865 = vmatpush1.bf16.msra.mxu1 %v1357_v20 }
 0x1a3   : > { %v559_v30 = vrot.slane %v555_v29, %v1863_v26 }
 0x1a5   : > { %v560_v31 = vsub.f32 %v555_v29, %v559_v30 }
 0x1a7   : > { %v561_v32 = vrot.slane %v560_v31, 4  ;;  %v568_v33 = vmul.f32 %v560_v31, %v560_v31 }
 0x1a9   : > { %v562_v35 = vadd.f32 %v561_v32, %v560_v31  ;;  %v569_v36 = vrot.slane %v568_v33, 4 }
 0x1ab   : > { %v563_v37 = vrot.slane %v562_v35, 2  ;;  %v570_v38 = vadd.f32 %v569_v36, %v568_v33 }
 0x1ad   : > { %v564_v40 = vadd.f32 %v563_v37, %v562_v35  ;;  %v571_v41 = vrot.slane %v570_v38, 2 }
 0x1af   : > { %v565_v42 = vrot.slane %v564_v40, 1  ;;  %v572_v43 = vadd.f32 %v571_v41, %v570_v38 }
 0x1b1   : > { %v566_v45 = vadd.f32 %v565_v42, %v564_v40  ;;  %v573_v46 = vrot.slane %v572_v43, 1 }
 0x1b3   : > { %v567_v47 = vmul.f32 0.125, %v566_v45  ;;  %v574_v48 = vadd.f32 %v573_v46, %v572_v43 }
 0x1b5   : > { %v575_v50 = vmul.f32 0.125, %v574_v48  ;;  %v576_v51 = vmul.f32 %v567_v47, %v567_v47  ;;  %v579_v56 = vadd.f32 %v567_v47, %v555_v29  ;;  %v731_v48 = vld [vmem:[%s1948_s5] sm:$0x1] }
 0x1b7   : > { %v577_v52 = vsub.f32 %v575_v50, %v576_v51 }
 0x1b9   : > { %v578_v53 = vmax.f32 %v577_v52, 0.0  ;;  %v735_v52 = vld [vmem:[%s1949_s6] sm:$0x1] }
 0x1bb   : > { %v581_v54 = vadd.f32 1e-05, %v578_v53 }
 0x1bd   : > { %1358 = vrsqrt.f32 %v581_v54 }
 0x1c7   : > { %v1359_v57 = vpop.eup %1358 }
 0x1c8   : > { %v583_v58 = vmul.f32 %v1359_v57, %v580_v55 }
 0x1ca   : > { %v585_v60 = vmul.f32 %v583_v58, %v579_v56  ;;  %v591_v61 = vrot.slane %v583_v58, %v1863_v26 }
 0x1cc   : > { %v586_v62 = vsub.f32 %v584_v59, %v585_v60  ;;  %v593_v63 = vmul.f32 %v591_v61, %v555_v29 }
 0x1ce   : > { %v598_v0 = vrot.slane %v586_v62, %v1863_v26 }
 0x1d0   : > { %v600_v1 = vadd.f32 %v598_v0, %v593_v63 }
 0x1d2   : > { %v601_v2 = vmax.f32 %v600_v1, 0.0 }
 0x1d4   : > { %v602_v3 = vpack.c.bf16 %v601_v2, %v601_v2 }
 0x1d6   : > { %1230 = vmatmul.mubr.bf16.vlgmr.msra.gmra.mrb[0].mxu0 %v602_v3 }
 0x2a9   : > { %v701_v21 = vpop.f32.mrb[0].mxu0 }
 0x2aa   : > { %v710_v22 = vrot.slane %v701_v21, %v1863_v26  ;;  %v1231_v23 = vpop.f32.mrb[1].mxu0 }
 0x2ab   : > { %v704_v24 = vpop.f32.mrb[2].mxu0 }
 0x2ac   : > { %v711_v27 = vsub.f32 %v701_v21, %v710_v22  ;;  %v1232_v28 = vpop.f32.mrb[3].mxu0 }
 0x2ae   : > { %v712_v29 = vrot.slane %v711_v27, 4  ;;  %v719_v30 = vmul.f32 %v711_v27, %v711_v27 }
 0x2b0   : > { %v713_v31 = vadd.f32 %v712_v29, %v711_v27  ;;  %v720_v32 = vrot.slane %v719_v30, 4 }
 0x2b2   : > { %v714_v33 = vrot.slane %v713_v31, 2  ;;  %v721_v34 = vadd.f32 %v720_v32, %v719_v30 }
 0x2b4   : > { %v715_v35 = vadd.f32 %v714_v33, %v713_v31  ;;  %v722_v36 = vrot.slane %v721_v34, 2 }
 0x2b6   : > { %v716_v37 = vrot.slane %v715_v35, 1  ;;  %v723_v38 = vadd.f32 %v722_v36, %v721_v34 }
 0x2b8   : > { %v717_v39 = vadd.f32 %v716_v37, %v715_v35  ;;  %v724_v40 = vrot.slane %v723_v38, 1 }
 0x2ba   : > { %v718_v41 = vmul.f32 0.125, %v717_v39  ;;  %v725_v42 = vadd.f32 %v724_v40, %v723_v38 }
 0x2bc   : > { %v726_v43 = vmul.f32 0.125, %v725_v42  ;;  %v727_v44 = vmul.f32 %v718_v41, %v718_v41  ;;  %v730_v50 = vadd.f32 %v718_v41, %v701_v21 }
 0x2be   : > { %v728_v45 = vsub.f32 %v726_v43, %v727_v44 }
 0x2c0   : > { %v729_v46 = vmax.f32 %v728_v45, 0.0  ;;  %v1578_v45 = vmov 1966171168  }
 0x2c2   : > { %v732_v47 = vadd.f32 1e-05, %v729_v46  ;;  %v948_v46 = vunpack.c.l.s4 %v1578_v45 }
 0x2c4   : > { %1360 = vrsqrt.f32 %v732_v47  ;;  %v949_v47 = vunpack.c.0.s8 %v948_v46 }
 0x2ce   : > { %v1361_v49 = vpop.eup %1360 }
 0x2cf   : > { %v734_v51 = vmul.f32 %v1361_v49, %v731_v48  ;;  %v952_v49 = vsub.s32 %v949_v47, %v1860_v25 }
 0x2d1   : > { %v736_v53 = vmul.f32 %v734_v51, %v730_v50  ;;  %v742_v54 = vrot.slane %v734_v51, %v1863_v26 }
 0x2d3   : > { %v737_v55 = vsub.f32 %v735_v52, %v736_v53  ;;  %v744_v56 = vmul.f32 %v742_v54, %v701_v21  ;;  %v939_v53 = vld [vmem:[%s1951_s8] sm:$0x3] }
 0x2d5   : > { %v749_v57 = vrot.slane %v737_v55, %v1863_v26  ;;  %v971_v55 = vsub.s32 1, %v1860_v25  ;;  %v963_v25 = vld [vmem:[%s1952_s9] sm:$0x3] }
 0x2d7   : > { %v751_v58 = vadd.f32 %v749_v57, %v744_v56 }
 0x2d9   : > { %v752_v59 = vmax.f32 %v751_v58, 0.0 }
 0x2db   : > { %v753_v60 = vpack.c.bf16 %v752_v59, %v752_v59 }
 0x2dd   : > { %883 = vmatmul.mubr.bf16.vlgmr.msra.gmra.mrb[0].mxu1 %v753_v60 }
 0x3b0   : > { %v1883_v61 = vpop.f32.mrb[0].mxu1 }
 0x3b1   : > { %v894_v62 = vrot.slane %v1883_v61, %v1863_v26  ;;  %v1887_v63 = vpop.f32.mrb[1].mxu1 }
 0x3b2   : > { %v898_v0 = vrot.slane %v1887_v63, %v1863_v26  ;;  %v888_v1 = vpop.f32.mrb[2].mxu1 }
 0x3b3   : > { %v899_v2 = vsub.f32 %v1883_v61, %v894_v62  ;;  %v889_v3 = vpop.f32.mrb[3].mxu1 }
 0x3b4   : > { %v900_v4 = vsub.f32 %v1887_v63, %v898_v0 }
 0x3b5   : > { %v901_v5 = vrot.slane %v899_v2, 4  ;;  %v915_v6 = vmul.f32 %v899_v2, %v899_v2 }
 0x3b6   : > { %v907_v7 = vrot.slane %v900_v4, 4  ;;  %v916_v8 = vmul.f32 %v900_v4, %v900_v4 }
 0x3b7   : > { %v902_v9 = vadd.f32 %v901_v5, %v899_v2  ;;  %v917_v10 = vrot.slane %v915_v6, 4 }
 0x3b8   : > { %v908_v11 = vadd.f32 %v907_v7, %v900_v4  ;;  %v923_v12 = vrot.slane %v916_v8, 4 }
 0x3b9   : > { %v903_v13 = vrot.slane %v902_v9, 2  ;;  %v918_v14 = vadd.f32 %v917_v10, %v915_v6 }
 0x3ba   : > { %v909_v15 = vrot.slane %v908_v11, 2  ;;  %v924_v16 = vadd.f32 %v923_v12, %v916_v8 }
 0x3bb   : > { %v904_v17 = vadd.f32 %v903_v13, %v902_v9  ;;  %v919_v18 = vrot.slane %v918_v14, 2 }
 0x3bc   : > { %v910_v19 = vadd.f32 %v909_v15, %v908_v11  ;;  %v925_v20 = vrot.slane %v924_v16, 2 }
 0x3bd   : > { %v905_v21 = vrot.slane %v904_v17, 1  ;;  %v920_v22 = vadd.f32 %v919_v18, %v918_v14 }
 0x3be   : > { %v911_v23 = vrot.slane %v910_v19, 1  ;;  %v926_v24 = vadd.f32 %v925_v20, %v924_v16 }
 0x3bf   : > { %v906_v27 = vadd.f32 %v905_v21, %v904_v17  ;;  %v921_v28 = vrot.slane %v920_v22, 1 }
 0x3c0   : > { %v912_v29 = vadd.f32 %v911_v23, %v910_v19  ;;  %v927_v30 = vrot.slane %v926_v24, 1 }
 0x3c1   : > { %v913_v31 = vmul.f32 0.125, %v906_v27  ;;  %v922_v32 = vadd.f32 %v921_v28, %v920_v22 }
 0x3c2   : > { %v914_v33 = vmul.f32 0.125, %v912_v29  ;;  %v928_v34 = vadd.f32 %v927_v30, %v926_v24 }
 0x3c3   : > { %v929_v35 = vmul.f32 0.125, %v922_v32  ;;  %v931_v36 = vmul.f32 %v913_v31, %v913_v31  ;;  %v937_v57 = vadd.f32 %v913_v31, %v1883_v61 }
 0x3c4   : > { %v930_v37 = vmul.f32 0.125, %v928_v34  ;;  %v932_v38 = vmul.f32 %v914_v33, %v914_v33  ;;  %v938_v58 = vadd.f32 %v914_v33, %v1887_v63 }
 0x3c5   : > { %v933_v39 = vsub.f32 %v929_v35, %v931_v36 }
 0x3c6   : > { %v934_v40 = vsub.f32 %v930_v37, %v932_v38 }
 0x3c7   : > { %v935_v41 = vmax.f32 %v933_v39, 0.0 }
 0x3c8   : > { %v936_v42 = vmax.f32 %v934_v40, 0.0 }
 0x3c9   : > { %v940_v43 = vadd.f32 1e-05, %v935_v41 }
 0x3ca   : > { %v941_v44 = vadd.f32 1e-05, %v936_v42 }
 0x3cb   : > { %1362 = vrsqrt.f32 %v940_v43 }
 0x3cc   : > { %1364 = vrsqrt.f32 %v941_v44 }
 0x3d5   : > { %v1363_v48 = vpop.eup %1362 }
 0x3d6   : > { %v1365_v50 = vpop.eup %1364 }
 0x3d7   : > { %v946_v51 = vcombine.low %v1363_v48, %v1365_v50 }
 0x3d9   : > { %v953_v52 = vrot.slane %v946_v51, %v952_v49 }
 0x3db   : > { %v960_v54 = vrot.slane %v953_v52, %v952_v49 }
 0x3dd   : > { %v962_v56 = vmul.f32 %v960_v54, %v939_v53 }
 0x3df   : > { %v968_v59 = vrot.slane %v962_v56, %v1863_v26  ;;  %v972_v60 = vrot.slane %v962_v56, %v971_v55 }
 0x3e1   : > { %v975_v62 = vmul.f32 %v968_v59, %v937_v57  ;;  %v976_v0 = vmul.f32 %v972_v60, %v938_v58  ;;  %v996_v1 = vmul.f32 %v968_v59, %v1883_v61  ;;  %v997_v2 = vmul.f32 %v972_v60, %v1887_v63 }
 0x3e3   : > { %v979_v3 = vcombine.low %v975_v62, %v976_v0 }
 0x3e5   : > { %v986_v4 = vrot.slane %v979_v3, %v952_v49 }
 0x3e7   : > { %v993_v5 = vrot.slane %v986_v4, %v952_v49 }
 0x3e9   : > { %v995_v6 = vsub.f32 %v963_v25, %v993_v5 }
 0x3eb   : > { %v1002_v7 = vrot.slane %v995_v6, %v1863_v26  ;;  %v1006_v8 = vrot.slane %v995_v6, %v971_v55 }
 0x3ed   : > { %v1009_v9 = vadd.f32 %v1002_v7, %v996_v1  ;;  %v1010_v10 = vadd.f32 %v1006_v8, %v997_v2 }
 0x3ef   : > { %1011 = vst [vmem:[#allocation11] sm:$0xff] %v1009_v9  ;;  %v1013_v11 = vand.u32 2147483647, %v1010_v10  ;;  %v1012_v15 = vmax.f32 %v1010_v10, 0.0 }
 0x3f1   : > { %v1014_v12 = vsub.f32 0.0, %v1013_v11 }
 0x3f3   : > { %v1015_v13 = vmul.f32 1.442695, %v1014_v12 }
 0x3f5   : > { %1366 = vpow2.f32 %v1015_v13 }
 0x3ff   : > { %v1367_v61 = vpop.eup %1366 }
 0x400   : > { %v1017_v63 = vadd.f32 1.0, %v1367_v61 }
 0x402   : > { %1368 = vlog2.f32 %v1017_v63 }
 0x40c   : > { %v1369_v14 = vpop.eup %1368 }
 0x40d   : > { %v1019_v16 = vmul.f32 0.6931472, %v1369_v14 }
 0x40f   : > { %v1020_v17 = vadd.f32 %v1019_v16, %v1012_v15 }
 0x411   : > { %1021 = vst [vmem:[#allocation11 + $0x8] sm:$0xff] %v1020_v17 }
 0x412 PF: > { %p1268_p0 = scmp.eq.s32.totalorder %s1654_s17, 2  ;;  %s1579_s12 = smov [#allocation11]  }
 0x413   : > { %s1029_s16 = sshll.u32 %s1579_s12, 4  ;;  %s1030_s16 = int_to_ptr.vmem [resolvable:$true] %s1029_s16 }
 0x414   : > { %s1486_s29 = scalar_lea.vmem %s1030_s16, 256  ;;  %p1493_p10 = scmp.lt.s32.totalorder %s1030_s16, %s1030_s16 }
 0x415   : > { %p1487_p2 = scmp.ne.s32.totalorder %s1030_s16, %s1486_s29  ;;  %p1494_p1 = scmp.lt.s32.totalorder %s1486_s29, %s1486_s29 }
 0x417   : > { %p1488_p13 = pnand %p1487_p2, %p1268_p0  ;;  %p1495_p11 = por %p1494_p1, %p1493_p10 }
 0x419   : > { %p1489_p3 = pneg %p1488_p13 }
 0x41b   : > { %p1496_p7 = pnand %p1495_p11, %p1489_p3 }
 0x41d   : > { %1499 = shalt.err (!%p1496_p7)
}
 0x41e   : > { %s1500_s0 = scalar_lea.hbm %s1953_s10, 256 }
 0x41f   : > { %p1501_p8 = scmp.ne.s32.totalorder %s1953_s10, %s1500_s0  ;;  %p1506_p6 = scmp.lt.u32.totalorder %s1500_s0, %s1953_s10 }
 0x421   : > { %p1502_p4 = pnand %p1501_p8, %p1268_p0 }
 0x423   : > { %p1503_p5 = pneg %p1502_p4 }
 0x425   : > { %p1508_p9 = pnand %p1506_p6, %p1503_p5 }
 0x427   : > { %1511 = shalt.err (!%p1508_p9)
}
 0x428   : > { %1246 = dma.vmem_to_hbm [thread:$0]  (%p1268_p0), %s1030_s16, 256, %s1953_s10, [#allocation5]  }
 0x429   : > { %1545 = dma.done.wait (%p1268_p0), [#allocation5], 256  }
 0x42a   : > { %1547 = vsyncadd (%p1268_p0), [#allocation5], 4294967040 }
 0x42b PF: > { %p25_p12 = scmp.ge.s32.totalorder %s1732_s28, 5   ;;  %s1979_s13 = smov %s1554_s14 }
 0x42c   : > { %s1980_s14 = smov %s1558_s15  ;;  %s1981_s15 = smov %s1741_s11 }
 0x42d   : > { %s1982_s16 = smov %s1732_s28  ;;  %27 = sbr.rel (!%p25_p12) target bundleno = 11 (0xb), region = 126 }
 0x434   :  { %1042 = vsyncpa [#allocation4], 1 }
 0x435   :  { %1044 = vsyncpa [#allocation4 + $0x1], 1 }
 0x436   :  { %1045 = vsyncpa [#allocation7], 1 }
 0x437   :  { %1047 = vsyncpa [#allocation7 + $0x1], 1 }
 0x438   :  { %1048 = vsyncpa [#allocation10], 1 }
 0x439   :  { %1049 = vsyncpa [#allocation5], 1 }
 0x43a   :  { %1051 = vsyncpa [#allocation5 + $0x1], 1 }

</bundles_post_ra>
